<compile_context>
chip_gen: v5e
topology: v5e:2x2
jax: 0.10.0
libtpu: 0.0.40
codegen_flags: <defaults>
</compile_context>

<pallas_src>
import jax
import jax.numpy as jnp
from jax.experimental import pallas as pl
from jax.experimental.pallas import tpu as pltpu


def _linreg_kernel(w_ref, b_ref, x_ref, o_ref):
    # Scalars live in SMEM as f32; do the affine transform in f32 on the VPU
    # and cast at the store (the cast is hidden under the HBM stream).
    w = w_ref[0]
    b = b_ref[0]
    y = w * x_ref[...].astype(jnp.float32) + b
    o_ref[...] = y.astype(o_ref.dtype)


def _round_up(x, m):
    return ((x + m - 1) // m) * m


def _cdiv(a, b):
    return (a + b - 1) // b


def linreg_forward(x, w, b, *, tile_m=2048, tile_n=1024, donate_x=False):
    """y = w * x + b, elementwise, scalar w and b.

    Accepts x of any rank / any shape (no divisibility requirements). No
    padding or slicing passes are introduced: ragged edges are handled by
    Pallas' masked edge blocks, and the output reshape back to the original
    shape is free (same element count).
    """
    orig_shape = x.shape
    orig_dtype = x.dtype
    total = x.size

    if total == 0:  # degenerate empty tensor
        return (jnp.float32(w) * x.astype(jnp.float32)
                + jnp.float32(b)).astype(orig_dtype)

    itemsize = x.dtype.itemsize
    # Native sublane multiple for the dtype: 8 (f32), 16 (bf16), 32 (int8/fp8).
    sub = max(8, 32 // max(1, itemsize))

    # ---- choose a lane-dense 2-D view (free reshape, never a pad/copy) -----
    C = 0
    for cand in (1024, 512, 256, 128):
        if total % cand == 0:
            C = cand
            break
    if C:
        R = total // C
        x2 = x.reshape(R, C)
    else:
        # Element count not a multiple of 128: keep the natural trailing dim
        # as the lane axis; cdiv grid + masked edge blocks keep it correct
        # with zero extra HBM passes.
        # TODO(synk): huge tensors with a tiny last dim AND total % 128 != 0
        # stay low-lane-density here (correct but bandwidth-inefficient).
        x2 = x.reshape(-1, orig_shape[-1]) if x.ndim >= 2 else x.reshape(1, -1)
        R, C = x2.shape

    # ---- block sizes: multiples of (sub, 128); edge blocks are masked ------
    tm = min(tile_m, _round_up(R, sub))
    tn = min(tile_n, _round_up(C, 128))
    grid = (_cdiv(R, tm), _cdiv(C, tn))

    # v7x has 2 TensorCores sharing HBM bandwidth: make sure a medium/large
    # slab yields at least 2 parallel blocks so both cores stream.
    # (Harmless no-op for v5e/v6e which have a single TensorCore.)
    if grid == (1, 1) and total * itemsize >= (1 << 20):
        if R >= 2 * sub:
            tm = _round_up(_cdiv(R, 2), sub)
        elif C >= 2 * 128:
            tn = _round_up(_cdiv(C, 2), 128)
        grid = (_cdiv(R, tm), _cdiv(C, tn))

    # Scalars stay f32 in SMEM regardless of x dtype.
    w_arr = jnp.asarray(w, jnp.float32).reshape((1,))
    b_arr = jnp.asarray(b, jnp.float32).reshape((1,))

    extra_kwargs = {}
    if donate_x:
        # x (input index 2) and the output have identical shape/dtype; donate
        # it to halve the peak HBM footprint when the caller drops x.
        extra_kwargs["input_output_aliases"] = {2: 0}

    out = pl.pallas_call(
        _linreg_kernel,
        out_shape=jax.ShapeDtypeStruct((R, C), orig_dtype),
        grid=grid,
        in_specs=[
            pl.BlockSpec(memory_space=pltpu.SMEM),            # w scalar (f32)
            pl.BlockSpec(memory_space=pltpu.SMEM),            # b scalar (f32)
            pl.BlockSpec((tm, tn), lambda i, j: (i, j)),      # x tile
        ],
        out_specs=pl.BlockSpec((tm, tn), lambda i, j: (i, j)),
        compiler_params=pltpu.CompilerParams(
            dimension_semantics=("parallel", "parallel"),
            # Double-buffered in+out at 8 MiB/block = 32 MiB, plus headroom;
            # comfortably under v7x's 64 MiB physical VMEM, and well above the
            # 16 MiB scoped default on v5e.
            vmem_limit_bytes=48 << 20,
        ),
        **extra_kwargs,
    )(w_arr, b_arr, x2)

    # Same element count as the input view -> free reshape back.
    return out.reshape(orig_shape)


if __name__ == "__main__":
    # Deterministic parameters exactly as in the PyTorch module's __init__.
    w = jnp.float32(3.0)
    b = jnp.float32(1.0)

    key = jax.random.PRNGKey(0)
    k1, k2, k3, k4 = jax.random.split(key, 4)

    cases = [
        # The exact 1-D input used in the PyTorch spec.
        jnp.array([1.0, 2.0, 3.0, 4.0], dtype=jnp.float32),
        # Aligned 2-D input: exercises the lane-dense flatten path.
        jax.random.normal(k1, (256, 512), dtype=jnp.float32),
        # Ragged input: exercises masked edge blocks (no pad, no slice).
        jax.random.normal(k2, (100, 200), dtype=jnp.float32),
        # Small 4-D input consistent with a (batch, channels, H, W) tensor.
        jax.random.normal(k3, (2, 4, 16, 16), dtype=jnp.float32),
        # bf16 input: exercises f32 scalars in SMEM + cast-at-store.
        jax.random.normal(k4, (64, 128), dtype=jnp.float32).astype(jnp.bfloat16),
    ]

    ok = True
    for x in cases:
        y = jax.block_until_ready(linreg_forward(x, w, b))
        assert y.shape == x.shape and y.dtype == x.dtype
        ref = (jnp.float32(3.0) * x.astype(jnp.float32)
               + jnp.float32(1.0)).astype(x.dtype)
        tol = 1e-6 if x.dtype == jnp.float32 else 1e-2
        ok = ok and bool(
            jnp.allclose(y.astype(jnp.float32), ref.astype(jnp.float32),
                         atol=tol, rtol=tol)
        )

    assert ok, "mismatch vs reference"
    print("KERNEL_OK")
</pallas_src>

<mosaic_0001>
module attributes {stable_mosaic.version = 11 : i64} {
  func.func @_linreg_kernel(%arg0: i32, %arg1: i32, %arg2: memref<1xf32, #tpu.memory_space<smem>>, %arg3: memref<1xf32, #tpu.memory_space<smem>>, %arg4: memref<8x128xf32, #tpu.memory_space<vmem>>, %arg5: memref<8x128xf32, #tpu.memory_space<vmem>>) attributes {dimension_semantics = [#tpu.dimension_semantics<parallel>, #tpu.dimension_semantics<parallel>], iteration_bounds = array<i64: 1, 1>, scalar_prefetch = 0 : i64, scratch_operands = 0 : i64, tpu.core_type = #tpu.core_type<tc>, window_params = [{transform_indices = @transform_0, window_bounds = array<i64: 1>}, {transform_indices = @transform_1, window_bounds = array<i64: 1>}, {transform_indices = @transform_2, window_bounds = array<i64: 8, 128>}, {transform_indices = @transform_3, window_bounds = array<i64: 8, 128>}]} {
    %c0 = arith.constant 0 : index
    %0 = memref.load %arg2[%c0] : memref<1xf32, #tpu.memory_space<smem>>
    %c0_0 = arith.constant 0 : index
    %1 = memref.load %arg3[%c0_0] : memref<1xf32, #tpu.memory_space<smem>>
    %c0_1 = arith.constant 0 : index
    %c0_2 = arith.constant 0 : index
    %2 = vector.load %arg4[%c0_1, %c0_2] : memref<8x128xf32, #tpu.memory_space<vmem>>, vector<8x128xf32>
    %3 = vector.broadcast %0 : f32 to vector<8x128xf32>
    %4 = arith.mulf %3, %2 : vector<8x128xf32>
    %5 = vector.broadcast %1 : f32 to vector<8x128xf32>
    %6 = arith.addf %4, %5 : vector<8x128xf32>
    %c0_3 = arith.constant 0 : index
    %c0_4 = arith.constant 0 : index
    %7 = vector.load %arg5[%c0_3, %c0_4] : memref<8x128xf32, #tpu.memory_space<vmem>>, vector<8x128xf32>
    tpu.vector_store %arg5[%c0_3, %c0_4], %6 {strides = array<i32>} : memref<8x128xf32, #tpu.memory_space<vmem>>, vector<8x128xf32>,
    return
  }
  func.func @transform_0(%arg0: i32, %arg1: i32) -> i32 {
    %c0_i32 = arith.constant 0 : i32
    %c0_i32_0 = arith.constant 0 : i32
    return %c0_i32 : i32
  }
  func.func @transform_1(%arg0: i32, %arg1: i32) -> i32 {
    %c0_i32 = arith.constant 0 : i32
    %c0_i32_0 = arith.constant 0 : i32
    return %c0_i32 : i32
  }
  func.func @transform_2(%arg0: i32, %arg1: i32) -> (i32, i32) {
    %c0_i32 = arith.constant 0 : i32
    return %arg0, %arg1 : i32, i32
  }
  func.func @transform_3(%arg0: i32, %arg1: i32) -> (i32, i32) {
    %c0_i32 = arith.constant 0 : i32
    return %arg0, %arg1 : i32, i32
  }
}

</mosaic_0001>

<bundles_post_ra>
// kernel: tpu_custom_call.1
= control target key start
LH: loop header
LB: loop body
LE: loop exit
PB: predicated region body
PF: predicated region fallthrough
CT: control target
= control target key end

     0   :  { %10 = vsyncpa [#allocation5], 0  ;;  %s107_s0 = inlined_call_operand.<no memory space> [shape: f32[1], index: 0, kind: input, shape index: {}]   ;;  %s108_s1 = inlined_call_operand.<no memory space> [shape: f32[1], index: 1, kind: input, shape index: {}]   ;;  %s109_s2 = inlined_call_operand.vmem [shape: f32[1,4], index: 2, kind: input, shape index: {}]   ;;  %s110_s3 = inlined_call_operand.hbm [shape: f32[1,4], index: 3, kind: output, shape index: {}]  }
   0x1   :  { %v19_v0 = vld [vmem:[%s109_s2] sm:$0xff]  ;;  %v20_v1 = vstv %s107_s0  ;;  %v22_v2 = vstv %s108_s1 }
   0x2   :  { %v21_v3 = vmul.f32 %v20_v1, %v19_v0 }
   0x4   :  { %v23_v4 = vadd.f32 %v22_v2, %v21_v3 }
   0x6   :  { %24 = vst [vmem:[#allocation4] sm:$0xff] %v23_v4 }
   0x7   :  { %28 = vsyncadd [#allocation5], 112  ;;  %s31_s20 = sshll.u32 %s110_s3, 4  ;;  %s72_s21 = smov [#allocation4]   ;;  %s32_s20 = int_to_ptr.hbm [resolvable:$true] %s31_s20 }
   0x8   :  { %s29_s22 = sshll.u32 %s72_s21, 4  ;;  %s73_s2 = smov 16   ;;  %s30_s22 = int_to_ptr.vmem [resolvable:$true] %s29_s22 }
   0x9   :  { %s74_s23 = smov 1  }
   0xa   :  { %37 = dma.vmem_to_hbm [thread:$0]  %s30_s22, 16, %s32_s20, [#allocation5], %s73_s2, %s73_s2, %s74_s23  }
   0xb   :  { %70 = dma.done.wait [#allocation5], 128  }
   0xc   :  { %71 = vsyncadd [#allocation5], 4294967168 }
   0xd   :  { %42 = vsyncpa [#allocation5], 1 }

</bundles_post_ra>
